<compile_context>
chip_gen: v6e
topology: v6e:2x2x1
jax: 0.10.0
libtpu: 0.0.40
codegen_flags: <defaults>
</compile_context>

<pallas_src>
import jax
import jax.numpy as jnp
from jax import lax
from jax.experimental import pallas as pl
from jax.experimental.pallas import tpu as pltpu

_K = 3
_TARGET_IN_TILE_BYTES = 2 * 1024 * 1024  # per-block input footprint target


def _round_down(x, m):
    return (x // m) * m


def _maxpool3x3_kernel(x_ref, o_ref):
    # x_ref block: (Th, 3, 3, <minor dims>) — both window axes are leading
    # (non-tiled) dims, so each jnp.maximum below is an elementwise VPU vmax on
    # tiles whose layout already matches the output tile.
    m = x_ref[:, 0, 0]
    for ki in range(_K):
        for kj in range(_K):
            if ki == 0 and kj == 0:
                continue
            m = jnp.maximum(m, x_ref[:, ki, kj])
    o_ref[...] = m


def maxpool2d_k3(x):
    """nn.MaxPool2d(kernel_size=3, ceil_mode=False) forward. x: (N, C, H, W)."""
    N, C, H, W = x.shape
    K = _K
    Ho, Wo = H // K, W // K            # floor mode, stride == kernel, no padding
    NC = N * C
    if Ho == 0 or Wo == 0:
        return jnp.zeros((N, C, Ho, Wo), x.dtype)

    itemsize = jnp.dtype(x.dtype).itemsize

    # ---- glue: crop to whole windows, put window dims leading, channels last ----
    xw = x[:, :, : Ho * K, : Wo * K].reshape(N, C, Ho, K, Wo, K)
    xw = jnp.transpose(xw, (2, 3, 5, 4, 0, 1))              # (Ho, K, K, Wo, N, C)

    if NC >= 128:
        # Lane axis = NC (lane-dense).  Tile Ho and NC.
        xw = xw.reshape(Ho, K, K, Wo, NC)
        ncb = min(NC, 512)
        if ncb < NC:
            budget_nc = _TARGET_IN_TILE_BYTES // (K * K * Wo * itemsize)
            ncb = min(ncb, max(128, _round_down(budget_nc, 128)))
        row_bytes = K * K * Wo * ncb * itemsize
        th = int(min(Ho, max(1, _TARGET_IN_TILE_BYTES // row_bytes)))
        grid = (pl.cdiv(Ho, th), pl.cdiv(NC, ncb))
        out = pl.pallas_call(
            _maxpool3x3_kernel,
            out_shape=jax.ShapeDtypeStruct((Ho, Wo, NC), x.dtype),
            grid=grid,
            in_specs=[pl.BlockSpec((th, K, K, Wo, ncb),
                                   lambda i, j: (i, 0, 0, 0, j))],
            out_specs=pl.BlockSpec((th, Wo, ncb), lambda i, j: (i, 0, j)),
            compiler_params=pltpu.CompilerParams(
                dimension_semantics=("parallel", "parallel")),
        )(xw)
    else:
        # Small NC: flatten (Wo, NC) into one lane axis so loads/stores are as
        # lane-dense as the problem allows.
        L = Wo * NC
        xw = xw.reshape(Ho, K, K, L)
        lb = L if L <= 1024 else 1024
        row_bytes = K * K * lb * itemsize
        th = int(min(Ho, max(1, _TARGET_IN_TILE_BYTES // row_bytes)))
        if th < Ho:
            # output block is (th, lb): second-minor dim must be 8-aligned or full.
            th = min(Ho, max(8, _round_down(th, 8)))
        grid = (pl.cdiv(Ho, th), pl.cdiv(L, lb))
        out = pl.pallas_call(
            _maxpool3x3_kernel,
            out_shape=jax.ShapeDtypeStruct((Ho, L), x.dtype),
            grid=grid,
            in_specs=[pl.BlockSpec((th, K, K, lb), lambda i, j: (i, 0, 0, j))],
            out_specs=pl.BlockSpec((th, lb), lambda i, j: (i, j)),
            compiler_params=pltpu.CompilerParams(
                dimension_semantics=("parallel", "parallel")),
        )(xw)

    # ---- glue: back to NCHW ----
    return jnp.transpose(out.reshape(Ho, Wo, N, C), (2, 3, 0, 1))


def _ref_maxpool(x):
    return lax.reduce_window(
        x, -jnp.inf, lax.max,
        window_dimensions=(1, 1, 3, 3),
        window_strides=(1, 1, 3, 3),
        padding="VALID",
    )


if __name__ == "__main__":
    key = jax.random.PRNGKey(0)

    # Small test matching the PyTorch module spec (exercises the small-NC path).
    x = jax.random.normal(key, (2, 4, 16, 16), dtype=jnp.float32)
    y = maxpool2d_k3(x)
    jax.block_until_ready(y)
    assert y.shape == (2, 4, 5, 5), y.shape
    assert jnp.allclose(y, _ref_maxpool(x)), "mismatch vs reference (small-NC path)"

    # Second small check that exercises the lane-dense NC>=128 path.
    x2 = jax.random.normal(jax.random.PRNGKey(1), (2, 64, 18, 18), dtype=jnp.float32)
    y2 = maxpool2d_k3(x2)
    jax.block_until_ready(y2)
    assert y2.shape == (2, 64, 6, 6), y2.shape
    assert jnp.allclose(y2, _ref_maxpool(x2)), "mismatch vs reference (NC-tiled path)"

    print("KERNEL_OK")
</pallas_src>

<mosaic_0001>
module attributes {stable_mosaic.version = 11 : i64} {
  func.func @_maxpool3x3_kernel(%arg0: i32, %arg1: i32, %arg2: memref<5x3x3x40xf32, #tpu.memory_space<vmem>>, %arg3: memref<5x40xf32, #tpu.memory_space<vmem>>) attributes {dimension_semantics = [#tpu.dimension_semantics<parallel>, #tpu.dimension_semantics<parallel>], iteration_bounds = array<i64: 1, 1>, scalar_prefetch = 0 : i64, scratch_operands = 0 : i64, tpu.core_type = #tpu.core_type<tc>, window_params = [{transform_indices = @transform_0, window_bounds = array<i64: 5, 3, 3, 40>}, {transform_indices = @transform_1, window_bounds = array<i64: 5, 40>}]} {
    %c0 = arith.constant 0 : index
    %c0_0 = arith.constant 0 : index
    %c0_1 = arith.constant 0 : index
    %c0_2 = arith.constant 0 : index
    %0 = vector.load %arg2[%c0, %c0_0, %c0_1, %c0_2] : memref<5x3x3x40xf32, #tpu.memory_space<vmem>>, vector<5x1x1x40xf32>
    %1 = vector.shape_cast %0 : vector<5x1x1x40xf32> to vector<5x40xf32>
    %c0_3 = arith.constant 0 : index
    %c0_4 = arith.constant 0 : index
    %c1 = arith.constant 1 : index
    %c0_5 = arith.constant 0 : index
    %2 = vector.load %arg2[%c0_3, %c0_4, %c1, %c0_5] : memref<5x3x3x40xf32, #tpu.memory_space<vmem>>, vector<5x1x1x40xf32>
    %3 = vector.shape_cast %2 : vector<5x1x1x40xf32> to vector<5x40xf32>
    %4 = arith.maximumf %1, %3 : vector<5x40xf32>
    %c0_6 = arith.constant 0 : index
    %c0_7 = arith.constant 0 : index
    %c2 = arith.constant 2 : index
    %c0_8 = arith.constant 0 : index
    %5 = vector.load %arg2[%c0_6, %c0_7, %c2, %c0_8] : memref<5x3x3x40xf32, #tpu.memory_space<vmem>>, vector<5x1x1x40xf32>
    %6 = vector.shape_cast %5 : vector<5x1x1x40xf32> to vector<5x40xf32>
    %7 = arith.maximumf %4, %6 : vector<5x40xf32>
    %c0_9 = arith.constant 0 : index
    %c1_10 = arith.constant 1 : index
    %c0_11 = arith.constant 0 : index
    %c0_12 = arith.constant 0 : index
    %8 = vector.load %arg2[%c0_9, %c1_10, %c0_11, %c0_12] : memref<5x3x3x40xf32, #tpu.memory_space<vmem>>, vector<5x1x1x40xf32>
    %9 = vector.shape_cast %8 : vector<5x1x1x40xf32> to vector<5x40xf32>
    %10 = arith.maximumf %7, %9 : vector<5x40xf32>
    %c0_13 = arith.constant 0 : index
    %c1_14 = arith.constant 1 : index
    %c1_15 = arith.constant 1 : index
    %c0_16 = arith.constant 0 : index
    %11 = vector.load %arg2[%c0_13, %c1_14, %c1_15, %c0_16] : memref<5x3x3x40xf32, #tpu.memory_space<vmem>>, vector<5x1x1x40xf32>
    %12 = vector.shape_cast %11 : vector<5x1x1x40xf32> to vector<5x40xf32>
    %13 = arith.maximumf %10, %12 : vector<5x40xf32>
    %c0_17 = arith.constant 0 : index
    %c1_18 = arith.constant 1 : index
    %c2_19 = arith.constant 2 : index
    %c0_20 = arith.constant 0 : index
    %14 = vector.load %arg2[%c0_17, %c1_18, %c2_19, %c0_20] : memref<5x3x3x40xf32, #tpu.memory_space<vmem>>, vector<5x1x1x40xf32>
    %15 = vector.shape_cast %14 : vector<5x1x1x40xf32> to vector<5x40xf32>
    %16 = arith.maximumf %13, %15 : vector<5x40xf32>
    %c0_21 = arith.constant 0 : index
    %c2_22 = arith.constant 2 : index
    %c0_23 = arith.constant 0 : index
    %c0_24 = arith.constant 0 : index
    %17 = vector.load %arg2[%c0_21, %c2_22, %c0_23, %c0_24] : memref<5x3x3x40xf32, #tpu.memory_space<vmem>>, vector<5x1x1x40xf32>
    %18 = vector.shape_cast %17 : vector<5x1x1x40xf32> to vector<5x40xf32>
    %19 = arith.maximumf %16, %18 : vector<5x40xf32>
    %c0_25 = arith.constant 0 : index
    %c2_26 = arith.constant 2 : index
    %c1_27 = arith.constant 1 : index
    %c0_28 = arith.constant 0 : index
    %20 = vector.load %arg2[%c0_25, %c2_26, %c1_27, %c0_28] : memref<5x3x3x40xf32, #tpu.memory_space<vmem>>, vector<5x1x1x40xf32>
    %21 = vector.shape_cast %20 : vector<5x1x1x40xf32> to vector<5x40xf32>
    %22 = arith.maximumf %19, %21 : vector<5x40xf32>
    %c0_29 = arith.constant 0 : index
    %c2_30 = arith.constant 2 : index
    %c2_31 = arith.constant 2 : index
    %c0_32 = arith.constant 0 : index
    %23 = vector.load %arg2[%c0_29, %c2_30, %c2_31, %c0_32] : memref<5x3x3x40xf32, #tpu.memory_space<vmem>>, vector<5x1x1x40xf32>
    %24 = vector.shape_cast %23 : vector<5x1x1x40xf32> to vector<5x40xf32>
    %25 = arith.maximumf %22, %24 : vector<5x40xf32>
    %c0_33 = arith.constant 0 : index
    %c0_34 = arith.constant 0 : index
    %26 = vector.load %arg3[%c0_33, %c0_34] : memref<5x40xf32, #tpu.memory_space<vmem>>, vector<5x40xf32>
    tpu.vector_store %arg3[%c0_33, %c0_34], %25 {strides = array<i32>} : memref<5x40xf32, #tpu.memory_space<vmem>>, vector<5x40xf32>,
    return
  }
  func.func @transform_0(%arg0: i32, %arg1: i32) -> (i32, i32, i32, i32) {
    %c0_i32 = arith.constant 0 : i32
    %c0_i32_0 = arith.constant 0 : i32
    %c0_i32_1 = arith.constant 0 : i32
    return %arg0, %c0_i32, %c0_i32_0, %arg1 : i32, i32, i32, i32
  }
  func.func @transform_1(%arg0: i32, %arg1: i32) -> (i32, i32) {
    %c0_i32 = arith.constant 0 : i32
    return %arg0, %arg1 : i32, i32
  }
}

</mosaic_0001>

<bundles_post_ra>
// kernel: tpu_custom_call.1
= control target key start
LH: loop header
LB: loop body
LE: loop exit
PB: predicated region body
PF: predicated region fallthrough
CT: control target
= control target key end

     0   :  { %6 = vsyncpa [#allocation3], 0  ;;  %s213_s0 = inlined_call_operand.hbm [shape: f32[5,3,3,40], index: 0, kind: input, shape index: {}]   ;;  %s214_s1 = inlined_call_operand.hbm [shape: f32[5,40], index: 1, kind: output, shape index: {}]  }
   0x1   :  { %7 = vsyncpa [#allocation4], 0  ;;  %s193_s6 = smov [#allocation2]  }
   0x2   :  { %s13_s7 = sshll.u32 %s193_s6, 4  ;;  %s14_s7 = int_to_ptr.vmem [resolvable:$true] %s13_s7 }
   0x3   :  { %s157_s8 = scalar_lea.vmem %s14_s7, 960  ;;  %p162_p1 = scmp.lt.s32.totalorder %s14_s7, %s14_s7 }
   0x4   :  { %p158_p0 = scmp.ne.s32.totalorder %s14_s7, %s157_s8  ;;  %p163_p2 = scmp.lt.s32.totalorder %s157_s8, %s157_s8 }
   0x6   :  { %p164_p3 = por %p163_p2, %p162_p1 }
   0x8   :  { %p165_p4 = pnand %p164_p3, %p158_p0 }
   0xa   :  { %168 = shalt.err (!%p165_p4)
}
   0xb   :  { %s194_s9 = smov 64   ;;  %s195_s10 = smov 4  }
   0xc   :  { %19 = dma.hbm_to_vmem [thread:$0]  %s213_s0, 960, %s14_s7, [#allocation3], %s194_s9, %s194_s9, %s195_s10  }
   0xd   :  { %189 = dma.done.wait [#allocation3], 960  }
   0xe   :  { %190 = vsyncadd [#allocation3], 4294966336  ;;  %v23_v0 = vld [vmem:[#allocation2] sm:$0x1]  ;;  %v24_v1 = vld [vmem:[#allocation2 + $0xc] sm:$0x1] }
   0xf   :  { %v25_v2 = vld [vmem:[#allocation2 + $0x18] sm:$0x1]  ;;  %v26_v3 = vld [vmem:[#allocation2 + $0x24] sm:$0x1]  ;;  %v27_v4 = vld [vmem:[#allocation2 + $0x30] sm:$0x1] }
  0x10   :  { %v28_v5 = vld [vmem:[#allocation2 + $0x1] sm:$0x1]  ;;  %v29_v6 = vld [vmem:[#allocation2 + $0xd] sm:$0x1]  ;;  %v30_v7 = vld [vmem:[#allocation2 + $0x19] sm:$0x1] }
  0x11   :  { %v31_v8 = vld [vmem:[#allocation2 + $0x25] sm:$0x1]  ;;  %v33_v9 = vmax.f32 %v23_v0, %v28_v5  ;;  %v32_v10 = vld [vmem:[#allocation2 + $0x31] sm:$0x1]  ;;  %v34_v11 = vmax.f32 %v24_v1, %v29_v6  ;;  %v35_v12 = vmax.f32 %v25_v2, %v30_v7  ;;  %v38_v14 = vld [vmem:[#allocation2 + $0x2] sm:$0x1] }
  0x12   :  { %v36_v13 = vmax.f32 %v26_v3, %v31_v8  ;;  %v39_v15 = vld [vmem:[#allocation2 + $0xe] sm:$0x1]  ;;  %v37_v16 = vmax.f32 %v27_v4, %v32_v10  ;;  %v40_v17 = vld [vmem:[#allocation2 + $0x1a] sm:$0x1]  ;;  %v41_v18 = vld [vmem:[#allocation2 + $0x26] sm:$0x1] }
  0x13   :  { %v42_v19 = vld [vmem:[#allocation2 + $0x32] sm:$0x1]  ;;  %v43_v20 = vmax.f32 %v33_v9, %v38_v14  ;;  %v44_v21 = vmax.f32 %v34_v11, %v39_v15  ;;  %v45_v22 = vmax.f32 %v35_v12, %v40_v17  ;;  %v49_v24 = vld [vmem:[#allocation2 + $0x4] sm:$0x1]  ;;  %v50_v25 = vld [vmem:[#allocation2 + $0x10] sm:$0x1] }
  0x14   :  { %v46_v23 = vmax.f32 %v36_v13, %v41_v18  ;;  %v51_v26 = vld [vmem:[#allocation2 + $0x1c] sm:$0x1]  ;;  %v47_v27 = vmax.f32 %v37_v16, %v42_v19  ;;  %v52_v28 = vld [vmem:[#allocation2 + $0x28] sm:$0x1]  ;;  %v53_v29 = vld [vmem:[#allocation2 + $0x34] sm:$0x1] }
  0x15   :  { %v54_v30 = vmax.f32 %v43_v20, %v49_v24  ;;  %v59_v31 = vld [vmem:[#allocation2 + $0x5] sm:$0x1]  ;;  %v55_v32 = vmax.f32 %v44_v21, %v50_v25  ;;  %v56_v33 = vmax.f32 %v45_v22, %v51_v26  ;;  %v60_v35 = vld [vmem:[#allocation2 + $0x11] sm:$0x1]  ;;  %v61_v36 = vld [vmem:[#allocation2 + $0x1d] sm:$0x1] }
  0x16   :  { %v57_v34 = vmax.f32 %v46_v23, %v52_v28  ;;  %v62_v37 = vld [vmem:[#allocation2 + $0x29] sm:$0x1]  ;;  %v58_v38 = vmax.f32 %v47_v27, %v53_v29  ;;  %v63_v39 = vld [vmem:[#allocation2 + $0x35] sm:$0x1]  ;;  %v69_v41 = vld [vmem:[#allocation2 + $0x6] sm:$0x1] }
  0x17   :  { %v64_v40 = vmax.f32 %v54_v30, %v59_v31  ;;  %v70_v42 = vld [vmem:[#allocation2 + $0x12] sm:$0x1]  ;;  %v65_v43 = vmax.f32 %v55_v32, %v60_v35  ;;  %v66_v44 = vmax.f32 %v56_v33, %v61_v36  ;;  %v71_v46 = vld [vmem:[#allocation2 + $0x1e] sm:$0x1]  ;;  %v72_v47 = vld [vmem:[#allocation2 + $0x2a] sm:$0x1] }
  0x18   :  { %v67_v45 = vmax.f32 %v57_v34, %v62_v37  ;;  %v73_v48 = vld [vmem:[#allocation2 + $0x36] sm:$0x1]  ;;  %v68_v49 = vmax.f32 %v58_v38, %v63_v39  ;;  %v80_v51 = vld [vmem:[#allocation2 + $0x8] sm:$0x1]  ;;  %v81_v52 = vld [vmem:[#allocation2 + $0x14] sm:$0x1] }
  0x19   :  { %v74_v50 = vmax.f32 %v64_v40, %v69_v41  ;;  %v82_v53 = vld [vmem:[#allocation2 + $0x20] sm:$0x1]  ;;  %v75_v54 = vmax.f32 %v65_v43, %v70_v42  ;;  %v76_v55 = vmax.f32 %v66_v44, %v71_v46  ;;  %v83_v57 = vld [vmem:[#allocation2 + $0x2c] sm:$0x1]  ;;  %v84_v58 = vld [vmem:[#allocation2 + $0x38] sm:$0x1] }
  0x1a   :  { %v77_v56 = vmax.f32 %v67_v45, %v72_v47  ;;  %v90_v59 = vld [vmem:[#allocation2 + $0x9] sm:$0x1]  ;;  %v78_v60 = vmax.f32 %v68_v49, %v73_v48  ;;  %v91_v62 = vld [vmem:[#allocation2 + $0x15] sm:$0x1]  ;;  %v92_v63 = vld [vmem:[#allocation2 + $0x21] sm:$0x1] }
  0x1b   :  { %v85_v61 = vmax.f32 %v74_v50, %v80_v51  ;;  %v93_v0 = vld [vmem:[#allocation2 + $0x2d] sm:$0x1]  ;;  %v86_v1 = vmax.f32 %v75_v54, %v81_v52  ;;  %v87_v2 = vmax.f32 %v76_v55, %v82_v53  ;;  %v94_v4 = vld [vmem:[#allocation2 + $0x39] sm:$0x1]  ;;  %v100_v5 = vld [vmem:[#allocation2 + $0xa] sm:$0x1] }
  0x1c   :  { %v88_v3 = vmax.f32 %v77_v56, %v83_v57  ;;  %v89_v6 = vmax.f32 %v78_v60, %v84_v58  ;;  %v101_v8 = vld [vmem:[#allocation2 + $0x16] sm:$0x1]  ;;  %v102_v9 = vld [vmem:[#allocation2 + $0x22] sm:$0x1]  ;;  %v103_v10 = vld [vmem:[#allocation2 + $0x2e] sm:$0x1] }
  0x1d   :  { %v95_v7 = vmax.f32 %v85_v61, %v90_v59  ;;  %v96_v11 = vmax.f32 %v86_v1, %v91_v62  ;;  %v97_v12 = vmax.f32 %v87_v2, %v92_v63  ;;  %v104_v14 = vld [vmem:[#allocation2 + $0x3a] sm:$0x1]  ;;  %vm116_vm0 = vcmask 1041409   ;;  %s196_s0 = smov [#allocation5]  }
  0x1e   :  { %v98_v13 = vmax.f32 %v88_v3, %v93_v0  ;;  %v99_v15 = vmax.f32 %v89_v6, %v94_v4  ;;  %vm119_vm1 = vcmask 1042434   ;;  %vm122_vm2 = vcmask 1043459   ;;  %s136_s13 = sshll.u32 %s196_s0, 4  ;;  %s137_s13 = int_to_ptr.vmem [resolvable:$true] %s136_s13 }
  0x1f   :  { %v105_v16 = vmax.f32 %v95_v7, %v100_v5  ;;  %v106_v17 = vmax.f32 %v96_v11, %v101_v8  ;;  %v107_v18 = vmax.f32 %v97_v12, %v102_v9  ;;  %vm125_vm3 = vcmask 1044484   ;;  %s169_s14 = scalar_lea.vmem %s137_s13, 128  ;;  %p174_p6 = scmp.lt.s32.totalorder %s137_s13, %s137_s13 }
  0x20   :  { %v108_v19 = vmax.f32 %v98_v13, %v103_v10  ;;  %v109_v20 = vmax.f32 %v99_v15, %v104_v14  ;;  %vm128_vm4 = vcmask 323584   ;;  %p170_p5 = scmp.ne.s32.totalorder %s137_s13, %s169_s14  ;;  %p175_p7 = scmp.lt.s32.totalorder %s169_s14, %s169_s14 }
  0x21   :  { %v115_v21 = vrot.slane %v106_v17, 7  ;;  %v118_v22 = vrot.slane %v107_v18, 6 }
  0x22   :  { %v121_v23 = vrot.slane %v108_v19, 5  ;;  %v124_v24 = vrot.slane %v109_v20, 4  ;;  %p176_p8 = por %p175_p7, %p174_p6 }
  0x23   :  { %v117_v25 = vsel %vm116_vm0, %v115_v21, %v105_v16 }
  0x24   :  { %v120_v26 = vsel %vm119_vm1, %v118_v22, %v117_v25  ;;  %p177_p9 = pnand %p176_p8, %p170_p5 }
  0x25   :  { %v123_v27 = vsel %vm122_vm2, %v121_v23, %v120_v26 }
  0x26   :  { %v126_v28 = vsel %vm125_vm3, %v124_v24, %v123_v27 }
  0x27   :  { %129 = vst.msk [vmem:[#allocation5] sm:$0x1f] %vm128_vm4, %v126_v28 }
  0x28   :  { %180 = shalt.err (!%p177_p9)
}
  0x29   :  { %139 = dma.vmem_to_hbm [thread:$0]  %s137_s13, 128, %s214_s1, [#allocation4]  }
  0x2a   :  { %191 = dma.done.wait [#allocation4], 128  }
  0x2b   :  { %192 = vsyncadd [#allocation4], 4294967168 }
  0x2c   :  { %143 = vsyncpa [#allocation3], 1 }
  0x2d   :  { %144 = vsyncpa [#allocation4], 1 }

</bundles_post_ra>
